<compile_context>
chip_gen: v5e
topology: v5e:2x2
jax: 0.10.0
libtpu: 0.0.40
codegen_flags: <defaults>
</compile_context>

<pallas_src>
import functools

import jax
import jax.numpy as jnp
from jax import lax
from jax.experimental import pallas as pl
from jax.experimental.pallas import tpu as pltpu

# 3-tap Gaussian weights, sigma = 1.0, normalized.
_G0 = 0.27406862
_G1 = 0.45186276
_G2 = 0.27406862


def _blur_kernel(x_ref, w_ref, o_ref, *, row_shift):
    """x_ref/o_ref: (TB, HW_p) tiles of flattened images; w_ref: (4, HW_p) masked taps."""
    hw = x_ref.shape[-1]
    x = x_ref[...].astype(jnp.float32)                 # (TB, HW_p), vectorized over TB
    w = w_ref[...]                                     # (4, HW_p), resident in VMEM
    wl, wr, wu, wd = w[0:1], w[1:2], w[2:3], w[3:4]    # (1, HW_p) each, broadcast over TB

    # Horizontal pass: left/right neighbours are +-1 along the flattened axis.
    # Pre-masked weights zero out taps that cross an image-row border
    # (zero-padding semantics), so the body is pure FMA + lane rolls.
    xl = pltpu.roll(x, shift=1, axis=1)                # value from k-1
    xr = pltpu.roll(x, shift=hw - 1, axis=1)           # value from k+1
    h = wl * xl + _G1 * x + wr * xr

    # Vertical pass: up/down neighbours are +-W along the flattened axis
    # (lane rolls only -- no sublane rolls, so ragged H is never an issue).
    hu = pltpu.roll(h, shift=row_shift, axis=1)        # value from k-W (row above)
    hd = pltpu.roll(h, shift=hw - row_shift, axis=1)   # value from k+W (row below)
    o_ref[...] = (wu * hu + _G1 * h + wd * hd).astype(o_ref.dtype)


def _pick_tb(num_rows, row_bytes, target_bytes=4 << 20, min_steps=4):
    """Images per block: a multiple of 8 (sublane tiling) targeting ~4 MiB tiles,
    preferring >= min_steps grid steps (>= 2 per v7x TensorCore) when possible."""
    if num_rows <= 8:
        return num_rows                       # block equals full dim -> always legal
    cap = (num_rows // 8) * 8                 # largest multiple of 8 <= num_rows
    tb = max(8, min(cap, (target_bytes // max(row_bytes, 1)) // 8 * 8))
    while tb > 8 and pl.cdiv(num_rows, tb) < min_steps:
        tb -= 8
    return tb


def _gaussian_blur_3x3(x):
    """3x3 separable Gaussian blur (sigma=1, zero padding) over (N, C, H, W)."""
    N, C, H, W = x.shape
    G = N * C
    HW = H * W
    HW_p = ((HW + 127) // 128) * 128          # lane-dense flattened width

    # Layout-preserving reshape: no transpose, no extra HBM round trip.
    xf = x.reshape(G, HW)
    if HW_p != HW:
        # One pad copy keeps rolls/stores lane-aligned; outputs in the pad
        # region are discarded below.
        xf = jnp.pad(xf, ((0, 0), (0, HW_p - HW)))

    # Border masks folded into the taps. In the flattened space all four are
    # plain (HW_p,) vectors (functions of position k only) -> tiny, fetched once.
    k = jnp.arange(HW_p)
    col = k % W
    row = k // W
    inside = k < HW
    wl = jnp.where(inside & (col >= 1), _G0, 0.0)
    wr = jnp.where(inside & (col <= W - 2), _G2, 0.0)
    wu = jnp.where(inside & (row >= 1), _G0, 0.0)
    wd = jnp.where(inside & (row <= H - 2), _G2, 0.0)
    weights = jnp.stack([wl, wr, wu, wd]).astype(jnp.float32)   # (4, HW_p)

    TB = _pick_tb(G, HW_p * x.dtype.itemsize)
    grid = (pl.cdiv(G, TB),)                  # non-divisor G -> masked last step

    out = pl.pallas_call(
        functools.partial(_blur_kernel, row_shift=W),
        out_shape=jax.ShapeDtypeStruct((G, HW_p), x.dtype),
        grid=grid,
        in_specs=[
            pl.BlockSpec((TB, HW_p), lambda g: (g, 0)),
            # Grid-invariant block: DMA'd once, stays resident in VMEM.
            pl.BlockSpec((4, HW_p), lambda g: (0, 0)),
        ],
        out_specs=pl.BlockSpec((TB, HW_p), lambda g: (g, 0)),
        compiler_params=pltpu.CompilerParams(
            dimension_semantics=("parallel",),
            # Explicit budget: 2x(2xTB tile) data buffers + weights fit with
            # headroom on v5e (16 MiB default scoped) through v7x (64 MiB phys).
            vmem_limit_bytes=32 << 20,
        ),
    )(xf, weights)

    if HW_p != HW:
        out = out[:, :HW]
    return out.reshape(N, C, H, W)


def random_apply(x, p, key):
    """x: (N, C, H, W). Applies the Gaussian blur with probability p, else identity."""
    # torch: `x if random.random() > p else fn(x)`  ->  apply fn iff u <= p.
    u = jax.random.uniform(key, ())
    # Hoisted coin flip: the identity branch is a true no-op (no HBM traffic).
    # Note: under vmap, lax.cond may lower to a select (both branches run).
    return lax.cond(u <= p, _gaussian_blur_3x3, lambda v: v, x)


def _blur_ref(x):
    """Pure-JAX reference for the 3x3 separable blur with zero padding."""
    xp = jnp.pad(x, ((0, 0), (0, 0), (0, 0), (1, 1)))
    h = _G0 * xp[..., :-2] + _G1 * xp[..., 1:-1] + _G2 * xp[..., 2:]
    hp = jnp.pad(h, ((0, 0), (0, 0), (1, 1), (0, 0)))
    return _G0 * hp[..., :-2, :] + _G1 * hp[..., 1:-1, :] + _G2 * hp[..., 2:, :]


if __name__ == "__main__":
    key = jax.random.PRNGKey(0)
    k_x, k_coin = jax.random.split(key)

    N, C, H, W = 2, 4, 16, 16
    x = jax.random.normal(k_x, (N, C, H, W), dtype=jnp.float32)
    p = 0.8  # probability of applying fn (the Gaussian blur)

    # Exercise the Pallas blur kernel directly and check against the reference.
    y_blur = jax.block_until_ready(_gaussian_blur_3x3(x))
    assert y_blur.shape == x.shape and y_blur.dtype == x.dtype
    assert jnp.allclose(y_blur, _blur_ref(x), atol=1e-4, rtol=1e-4)

    # Full RandomApply semantics (coin flip hoisted to lax.cond).
    y = jax.block_until_ready(random_apply(x, p, k_coin))
    assert y.shape == x.shape and y.dtype == x.dtype
    u = jax.random.uniform(k_coin, ())
    expected = y_blur if bool(u <= p) else x
    assert jnp.allclose(y, expected, atol=1e-4, rtol=1e-4)

    print("KERNEL_OK")
</pallas_src>

<mosaic_0001>
module attributes {stable_mosaic.version = 11 : i64} {
  func.func @_blur_kernel(%arg0: i32, %arg1: memref<8x256xf32, #tpu.memory_space<vmem>>, %arg2: memref<4x256xf32, #tpu.memory_space<vmem>>, %arg3: memref<8x256xf32, #tpu.memory_space<vmem>>) attributes {dimension_semantics = [#tpu.dimension_semantics<parallel>], iteration_bounds = array<i64: 1>, scalar_prefetch = 0 : i64, scratch_operands = 0 : i64, tpu.core_type = #tpu.core_type<tc>, window_params = [{transform_indices = @transform_0, window_bounds = array<i64: 8, 256>}, {pipeline_mode = #tpu.pipeline_mode<synchronous>, transform_indices = @transform_1, window_bounds = array<i64: 4, 256>}, {transform_indices = @transform_2, window_bounds = array<i64: 8, 256>}]} {
    %c0 = arith.constant 0 : index
    %c0_0 = arith.constant 0 : index
    %0 = vector.load %arg1[%c0, %c0_0] : memref<8x256xf32, #tpu.memory_space<vmem>>, vector<8x256xf32>
    %c0_1 = arith.constant 0 : index
    %c0_2 = arith.constant 0 : index
    %1 = vector.load %arg2[%c0_1, %c0_2] : memref<4x256xf32, #tpu.memory_space<vmem>>, vector<4x256xf32>
    %2 = vector.extract_strided_slice %1 {offsets = [0, 0], sizes = [1, 256], strides = [1, 1]} : vector<4x256xf32> to vector<1x256xf32>
    %3 = vector.extract_strided_slice %1 {offsets = [1, 0], sizes = [1, 256], strides = [1, 1]} : vector<4x256xf32> to vector<1x256xf32>
    %4 = vector.extract_strided_slice %1 {offsets = [2, 0], sizes = [1, 256], strides = [1, 1]} : vector<4x256xf32> to vector<1x256xf32>
    %5 = vector.extract_strided_slice %1 {offsets = [3, 0], sizes = [1, 256], strides = [1, 1]} : vector<4x256xf32> to vector<1x256xf32>
    %c1_i32 = arith.constant 1 : i32
    %6 = tpu.dynamic_rotate %0 by %c1_i32 dim 1 : vector<8x256xf32>, i32 -> vector<8x256xf32>
    %c255_i32 = arith.constant 255 : i32
    %7 = tpu.dynamic_rotate %0 by %c255_i32 dim 1 : vector<8x256xf32>, i32 -> vector<8x256xf32>
    %8 = vector.broadcast %2 : vector<1x256xf32> to vector<8x256xf32>
    %9 = arith.mulf %8, %6 : vector<8x256xf32>
    %cst = arith.constant 0.451862752 : f32
    %10 = vector.broadcast %cst : f32 to vector<8x256xf32>
    %11 = arith.mulf %10, %0 : vector<8x256xf32>
    %12 = arith.addf %9, %11 : vector<8x256xf32>
    %13 = vector.broadcast %3 : vector<1x256xf32> to vector<8x256xf32>
    %14 = arith.mulf %13, %7 : vector<8x256xf32>
    %15 = arith.addf %12, %14 : vector<8x256xf32>
    %c16_i32 = arith.constant 16 : i32
    %16 = tpu.dynamic_rotate %15 by %c16_i32 dim 1 : vector<8x256xf32>, i32 -> vector<8x256xf32>
    %c240_i32 = arith.constant 240 : i32
    %17 = tpu.dynamic_rotate %15 by %c240_i32 dim 1 : vector<8x256xf32>, i32 -> vector<8x256xf32>
    %18 = vector.broadcast %4 : vector<1x256xf32> to vector<8x256xf32>
    %19 = arith.mulf %18, %16 : vector<8x256xf32>
    %cst_3 = arith.constant 0.451862752 : f32
    %20 = vector.broadcast %cst_3 : f32 to vector<8x256xf32>
    %21 = arith.mulf %20, %15 : vector<8x256xf32>
    %22 = arith.addf %19, %21 : vector<8x256xf32>
    %23 = vector.broadcast %5 : vector<1x256xf32> to vector<8x256xf32>
    %24 = arith.mulf %23, %17 : vector<8x256xf32>
    %25 = arith.addf %22, %24 : vector<8x256xf32>
    %c0_4 = arith.constant 0 : index
    %c0_5 = arith.constant 0 : index
    %26 = vector.load %arg3[%c0_4, %c0_5] : memref<8x256xf32, #tpu.memory_space<vmem>>, vector<8x256xf32>
    tpu.vector_store %arg3[%c0_4, %c0_5], %25 {strides = array<i32>} : memref<8x256xf32, #tpu.memory_space<vmem>>, vector<8x256xf32>,
    return
  }
  func.func @transform_0(%arg0: i32) -> (i32, i32) {
    %c0_i32 = arith.constant 0 : i32
    %c0_i32_0 = arith.constant 0 : i32
    return %arg0, %c0_i32 : i32, i32
  }
  func.func @transform_1(%arg0: i32) -> (i32, i32) {
    %c0_i32 = arith.constant 0 : i32
    %c0_i32_0 = arith.constant 0 : i32
    %c0_i32_1 = arith.constant 0 : i32
    return %c0_i32, %c0_i32_0 : i32, i32
  }
  func.func @transform_2(%arg0: i32) -> (i32, i32) {
    %c0_i32 = arith.constant 0 : i32
    %c0_i32_0 = arith.constant 0 : i32
    return %arg0, %c0_i32 : i32, i32
  }
}

</mosaic_0001>

<bundles_post_ra>
// kernel: tpu_custom_call.1
= control target key start
LH: loop header
LB: loop body
LE: loop exit
PB: predicated region body
PF: predicated region fallthrough
CT: control target
= control target key end

     0   :  { %7 = vsyncpa [#allocation3], 0  ;;  %s254_s0 = inlined_call_operand.hbm [shape: f32[8,256], index: 0, kind: input, shape index: {}]   ;;  %s255_s1 = inlined_call_operand.hbm [shape: f32[4,256], index: 1, kind: input, shape index: {}]   ;;  %s256_s2 = inlined_call_operand.hbm [shape: f32[8,256], index: 2, kind: output, shape index: {}]  }
   0x1   :  { %8 = vsyncpa [#allocation6], 0 }
   0x2   :  { %9 = vsyncpa [#allocation4], 0  ;;  %s15_s11 = sshll.u32 %s254_s0, 4  ;;  %s223_s12 = smov [#allocation2]   ;;  %s16_s11 = int_to_ptr.hbm [resolvable:$true] %s15_s11 }
   0x3   :  { %s17_s13 = sshll.u32 %s223_s12, 4  ;;  %s26_s16 = sshll.u32 %s255_s1, 4  ;;  %s18_s13 = int_to_ptr.vmem [resolvable:$true] %s17_s13  ;;  %s27_s16 = int_to_ptr.hbm [resolvable:$true] %s26_s16 }
   0x4   :  { %20 = dma.hbm_to_vmem [thread:$0]  %s16_s11, 256, %s18_s13, [#allocation3]  }
   0x5   :  { %s224_s17 = smov [#allocation5]  }
   0x6   :  { %s28_s18 = sshll.u32 %s224_s17, 4  ;;  %s29_s18 = int_to_ptr.vmem [resolvable:$true] %s28_s18 }
   0x7   :  { %31 = dma.hbm_to_vmem [thread:$0]  %s27_s16, 128, %s29_s18, [#allocation6]  }
   0x8   :  { %217 = dma.done.wait [#allocation3], 256  }
   0x9   :  { %218 = vsyncadd [#allocation3], 4294967040 }
   0xa   :  { %219 = dma.done.wait [#allocation6], 128  }
   0xb   :  { %220 = vsyncadd [#allocation6], 4294967168  ;;  %v40_v0 = vld [vmem:[#allocation2] sm:$0xff]  ;;  %s225_s0 = smov 127   ;;  %s226_s19 = smov 1   ;;  %v41_v1 = vld [vmem:[#allocation2 + $0x8] sm:$0xff]  ;;  %v47_v2 = vlaneseq }
   0xc   :  { %52 = vrot.lane.b32.xlu1 %v40_v0, %s225_s0  ;;  %43 = vrot.lane.b32.xlu0 %v40_v0, %s226_s19  ;;  %v42_v3 = vld [vmem:[#allocation5] sm:$0xff]  ;;  %v68_v13 = vmul.f32 0.45186275, %v40_v0  ;;  %v69_v14 = vmul.f32 0.45186275, %v41_v1  ;;  %s227_s1 = smov 112  }
   0xd   :  { %v48_v6 = vand.u32 127, %v47_v2  ;;  %v60_v7 = vperm.slane %v42_v3, 0  ;;  %v61_v8 = vperm.slane %v42_v3, 4  ;;  %v72_v9 = vperm.slane %v42_v3, 1  ;;  %s228_s20 = smov 16   ;;  %s229_s21 = smov [#allocation7]  }
   0xe   :  { %v73_v10 = vperm.slane %v42_v3, 5  ;;  %v96_v32 = vperm.slane %v42_v3, 2  ;;  %v97_v33 = vperm.slane %v42_v3, 6  ;;  %v108_v37 = vperm.slane %v42_v3, 3  ;;  %s125_s22 = sshll.u32 %s229_s21, 4  ;;  %s127_s25 = sshll.u32 %s256_s2, 4  ;;  %s126_s22 = int_to_ptr.vmem [resolvable:$true] %s125_s22  ;;  %s128_s25 = int_to_ptr.hbm [resolvable:$true] %s127_s25 }
   0xf   :  { %vm56_vm0 = vcmp.lt.s32.totalorder %v48_v6, 127  ;;  %vm49_vm1 = vcmp.lt.s32.totalorder %v48_v6, 1  ;;  %v64_v11 = vperm.slane %v60_v7, 0  ;;  %v65_v12 = vperm.slane %v61_v8, 0 }
  0x10   :  { %v76_v15 = vperm.slane %v72_v9, 1  ;;  %v77_v16 = vperm.slane %v73_v10, 1  ;;  %vm86_vm2 = vcmp.lt.s32.totalorder %v48_v6, 16  ;;  %v100_v35 = vperm.slane %v96_v32, 2 }
  0x11   :  { %v101_v36 = vperm.slane %v97_v33, 2  ;;  %v109_v38 = vperm.slane %v42_v3, 7  ;;  %vm93_vm3 = vcmp.lt.s32.totalorder %v48_v6, 112  ;;  %v112_v43 = vperm.slane %v108_v37, 3 }
  0x13   :  { %v113_v44 = vperm.slane %v109_v38, 3 }
  0x14   :  { %54 = vrot.lane.b32.xlu1 %v41_v1, %s225_s0  ;;  %45 = vrot.lane.b32.xlu0 %v41_v1, %s226_s19 }
  0x7e   :  { %v53_v4 = vpop.permute.xlu1 %52  ;;  %v44_v5 = vpop.permute.xlu0 %43 }
  0x86   :  { %v55_v17 = vpop.permute.xlu1 %54  ;;  %v46_v18 = vpop.permute.xlu0 %45 }
  0x87   :  { %v57_v19 = vsel %vm56_vm0, %v53_v4, %v55_v17  ;;  %v58_v20 = vsel %vm56_vm0, %v55_v17, %v53_v4  ;;  %v50_v21 = vsel %vm49_vm1, %v44_v5, %v46_v18  ;;  %v51_v22 = vsel %vm49_vm1, %v46_v18, %v44_v5 }
  0x88   :  { %v66_v23 = vmul.f32 %v64_v11, %v51_v22  ;;  %v67_v24 = vmul.f32 %v65_v12, %v50_v21  ;;  %v78_v25 = vmul.f32 %v76_v15, %v57_v19  ;;  %v79_v26 = vmul.f32 %v77_v16, %v58_v20 }
  0x8a   :  { %v70_v27 = vadd.f32 %v68_v13, %v66_v23  ;;  %v71_v28 = vadd.f32 %v69_v14, %v67_v24 }
  0x8c   :  { %v81_v29 = vadd.f32 %v79_v26, %v71_v28  ;;  %v80_v30 = vadd.f32 %v78_v25, %v70_v27 }
  0x8e   :  { %91 = vrot.lane.b32.xlu1 %v81_v29, %s227_s1  ;;  %89 = vrot.lane.b32.xlu0 %v80_v30, %s227_s1  ;;  %v105_v45 = vmul.f32 0.45186275, %v81_v29  ;;  %v104_v46 = vmul.f32 0.45186275, %v80_v30 }
  0x8f   :  { %82 = vrot.lane.b32.xlu2 %v80_v30, %s228_s20 }
  0x97   :  { %84 = vrot.lane.b32.xlu2 %v81_v29, %s228_s20 }
  0xe9   :  { %v83_v31 = vpop.permute.xlu2 %82 }
  0xf1   :  { %v85_v34 = vpop.permute.xlu2 %84 }
  0xf2   :  { %v87_v39 = vsel %vm86_vm2, %v83_v31, %v85_v34  ;;  %v88_v40 = vsel %vm86_vm2, %v85_v34, %v83_v31 }
  0xf3   :  { %v102_v41 = vmul.f32 %v100_v35, %v88_v40  ;;  %v103_v42 = vmul.f32 %v101_v36, %v87_v39 }
  0xf5   :  { %v106_v51 = vadd.f32 %v104_v46, %v102_v41  ;;  %v107_v52 = vadd.f32 %v105_v45, %v103_v42 }
 0x100   :  { %v92_v47 = vpop.permute.xlu1 %91  ;;  %v90_v48 = vpop.permute.xlu0 %89 }
 0x101   :  { %v94_v49 = vsel %vm93_vm3, %v90_v48, %v92_v47  ;;  %v95_v50 = vsel %vm93_vm3, %v92_v47, %v90_v48 }
 0x102   :  { %v114_v53 = vmul.f32 %v112_v43, %v94_v49  ;;  %v115_v54 = vmul.f32 %v113_v44, %v95_v50 }
 0x104   :  { %v116_v55 = vadd.f32 %v114_v53, %v106_v51  ;;  %v117_v56 = vadd.f32 %v115_v54, %v107_v52 }
 0x106   :  { %118 = vst [vmem:[#allocation7] sm:$0xff] %v116_v55 }
 0x107   :  { %119 = vst [vmem:[#allocation7 + $0x8] sm:$0xff] %v117_v56 }
 0x108   :  { %130 = dma.vmem_to_hbm [thread:$0]  %s126_s22, 256, %s128_s25, [#allocation4]  }
 0x109   :  { %221 = dma.done.wait [#allocation4], 256  }
 0x10a   :  { %222 = vsyncadd [#allocation4], 4294967040 }
 0x10b   :  { %135 = vsyncpa [#allocation3], 1 }
 0x10c   :  { %136 = vsyncpa [#allocation6], 1 }
 0x10d   :  { %137 = vsyncpa [#allocation4], 1 }

</bundles_post_ra>
